<compile_context>
chip_gen: v5e
topology: v5e:2x2
jax: 0.10.0
libtpu: 0.0.40
codegen_flags: <defaults>
</compile_context>

<pallas_src>
import functools
import math

import jax
import jax.numpy as jnp
from jax.experimental import pallas as pl
from jax.experimental.pallas import tpu as pltpu


def _cib_fused_kernel(act_ref, slab1_ref, slab2_ref, out_ref, loss_ref,
                      *, n, x_sum, b_dim, d_dim, inter_dim):
    CI = 3 * inter_dim
    B3 = 3 * b_dim
    D3 = 3 * d_dim

    # ---- unpack activation slab: [x_cat | labels | eps_b | eps_y] ----
    act = act_ref[...]
    x_cat = act[:, :x_sum]                                   # (N, X0+X1+X2)
    y = act[:, x_sum:x_sum + 1]                              # (N, 1)
    eps_b = act[:, x_sum + 1:x_sum + 1 + B3]                 # (N, 3B)
    eps_y = act[:, x_sum + 1 + B3:x_sum + 1 + B3 + D3]       # (N, 3D)

    # ---- unpack weight slab 1: [[W1 | Wc1x], [0 | Wc1b], [b1 | bc1]] ----
    slab1 = slab1_ref[...]
    Wx = slab1[:x_sum, :]                                    # (Xsum, 2CI)
    Wc1b = slab1[x_sum:x_sum + B3, CI:2 * CI]                # (3B, CI)
    bias1 = slab1[x_sum + B3:x_sum + B3 + 1, :]              # (1, 2CI)
    b1 = bias1[:, :CI]
    bc1 = bias1[:, CI:]

    # ---- unpack weight slab 2: [[W2 | Wc2], [b2 | bc2]] ----
    slab2 = slab2_ref[...]
    W2 = slab2[:CI, :2 * B3]                                 # (CI, 6B)
    Wc2 = slab2[:CI, 2 * B3:]                                # (CI, 6D)
    bias2 = slab2[CI:CI + 1, :]
    b2 = bias2[:, :2 * B3]
    bc2 = bias2[:, 2 * B3:]

    # ---- encoders (all 3 branches block-diag fused) ----
    pre = jnp.dot(x_cat, Wx, preferred_element_type=jnp.float32)   # (N, 2CI)
    h = jnp.maximum(pre[:, :CI] + b1, 0.0)
    # TODO(synk): nn.Dropout(drop_prob) is stochastic in train mode; modeled as
    # eval-mode identity here.

    mlv = jnp.dot(h, W2, preferred_element_type=jnp.float32) + b2  # (N, 6B)
    mu = mlv[:, :B3]                                                # [mu_v|mu_a|mu_t]
    lv = mlv[:, B3:]                                                # [lv_v|lv_a|lv_t]
    e05 = jnp.exp(0.5 * lv)                                         # std, reused below
    b_all = mu + eps_b * e05                                        # [b_v|b_a|b_t]
    out_ref[...] = b_all                                            # single store

    kl_elem = 1.0 + lv - mu * mu - e05 * e05                        # (N, 3B)

    # ---- conditional Gaussian estimators (block-diag fused) ----
    hc = jnp.maximum(
        jnp.dot(b_all, Wc1b, preferred_element_type=jnp.float32)
        + pre[:, CI:] + bc1, 0.0)                                   # (N, CI)

    mlv_c = jnp.dot(hc, Wc2, preferred_element_type=jnp.float32) + bc2  # (N, 6D)
    mu_c = mlv_c[:, :D3]
    lv_c = mlv_c[:, D3:]
    e05c = jnp.exp(0.5 * lv_c)
    y_pred = mu_c + eps_y * e05c                                    # (N, 3D)

    sq = (y_pred - y) ** 2                                          # y broadcast (N,1)->(N,3D)
    klc_elem = 1.0 + lv_c - mu_c * mu_c - e05c * e05c               # (N, 3D)

    def branch_losses(i):
        kl = (-0.5 / (n * b_dim)) * jnp.sum(
            kl_elem[:, i * b_dim:(i + 1) * b_dim], keepdims=True)       # (1,1)
        recon = jnp.sum(sq[:, i * d_dim:(i + 1) * d_dim],
                        keepdims=True) / (n * d_dim)                    # (1,1)
        klc = (-0.5 / n) * jnp.sum(
            klc_elem[:, i * d_dim:(i + 1) * d_dim], keepdims=True)      # (1,1)
        return kl, recon + klc

    kl_v, c_v = branch_losses(0)
    kl_a, c_a = branch_losses(1)
    kl_t, c_t = branch_losses(2)

    zero = jnp.zeros((1, 1), jnp.float32)
    # single packed store: [kl_v, cond_v, kl_a, cond_a, kl_t, cond_t, 0, 0]
    loss_ref[...] = jnp.concatenate(
        [kl_v, c_v, kl_a, c_a, kl_t, c_t, zero, zero], axis=1)


def _init_linear(key, fan_in, fan_out):
    """Matches torch.nn.Linear default init: U(-1/sqrt(fan_in), 1/sqrt(fan_in))."""
    kw, kb = jax.random.split(key)
    bound = 1.0 / math.sqrt(fan_in)
    W = jax.random.uniform(kw, (fan_in, fan_out), jnp.float32, -bound, bound)
    b = jax.random.uniform(kb, (fan_out,), jnp.float32, -bound, bound)
    return W, b


def _make_forward(x_dims, inter_dim, b_dim, d_dim, beta, gamma, sigma):
    x_sum = sum(x_dims)

    def fwd(slab1, slab2, visual, acoustic, text, labels, key):
        n = visual.shape[0]
        kb, ky = jax.random.split(key)
        eps_b = jax.random.normal(kb, (n, 3 * b_dim), jnp.float32)
        eps_y = jax.random.normal(ky, (n, 3 * d_dim), jnp.float32)
        labels = labels.astype(jnp.float32).reshape(n, 1)

        act = jnp.concatenate(
            [visual.astype(jnp.float32), acoustic.astype(jnp.float32),
             text.astype(jnp.float32), labels, eps_b, eps_y], axis=1)

        kernel = functools.partial(
            _cib_fused_kernel, n=n, x_sum=x_sum, b_dim=b_dim, d_dim=d_dim,
            inter_dim=inter_dim)

        vmem = pl.BlockSpec(memory_space=pltpu.MemorySpace.VMEM)
        out, losses = pl.pallas_call(
            kernel,
            out_shape=(jax.ShapeDtypeStruct((n, 3 * b_dim), jnp.float32),
                       jax.ShapeDtypeStruct((1, 8), jnp.float32)),
            in_specs=[vmem, vmem, vmem],
            out_specs=(vmem, vmem),
        )(act, slab1, slab2)

        kl_v, c_v = losses[0, 0], losses[0, 1]
        kl_a, c_a = losses[0, 2], losses[0, 3]
        kl_t, c_t = losses[0, 4], losses[0, 5]
        total = (beta * (kl_v + c_v) + gamma * (kl_a + c_a)
                 + sigma * (kl_t + c_t))
        return out, total, kl_v, c_v, kl_a, c_a, kl_t, c_t

    return jax.jit(fwd)


class CIBModelPallas:
    def __init__(self, X0_dim, X1_dim, X2_dim, inter_dim, B_dim, output_dim,
                 p_lambda, beta, gamma, sigma, drop_prob, key):
        self.p_lambda = p_lambda      # stored but unused in forward (matches ref)
        self.drop_prob = drop_prob
        I, B, D = inter_dim, B_dim, output_dim
        x_dims = (X0_dim, X1_dim, X2_dim)
        Xs = sum(x_dims)
        CI = 3 * I

        kiter = iter(jax.random.split(key, 15))
        nk = lambda: next(kiter)

        # per-branch encoder params (branch order: v, a, t)
        W1s, b1s, W2s, b2s = [], [], [], []
        for xd in x_dims:
            W, b = _init_linear(nk(), xd, I); W1s.append(W); b1s.append(b)
            W, b = _init_linear(nk(), I, 2 * B); W2s.append(W); b2s.append(b)

        # conditional estimators: v:(b_v, acoustic), a:(b_a, text), t:(b_t, visual)
        cond_x_dims = (X1_dim, X2_dim, X0_dim)
        Wc1s, bc1s, Wmus, bmus, Wlvs, blvs = [], [], [], [], [], []
        for xd in cond_x_dims:
            W, b = _init_linear(nk(), B + xd, I); Wc1s.append(W); bc1s.append(b)
            W, b = _init_linear(nk(), I, D); Wmus.append(W); bmus.append(b)
            W, b = _init_linear(nk(), I, D); Wlvs.append(W); blvs.append(b)

        # ---- weight slab 1: (Xs + 3B + 1, 2*CI) ----
        # cols [0,CI):  W1 block-diag (encoders);  bias row at the bottom
        # cols [CI,2CI): Wc1x (cond, routed to the correct modality) + Wc1b block
        slab1 = jnp.zeros((Xs + 3 * B + 1, 2 * CI), jnp.float32)
        x_off = [0, X0_dim, X0_dim + X1_dim]
        for i in range(3):
            slab1 = slab1.at[x_off[i]:x_off[i] + x_dims[i],
                             i * I:(i + 1) * I].set(W1s[i])
        cond_src = [1, 2, 0]   # cond_v<-acoustic, cond_a<-text, cond_t<-visual
        for i in range(3):
            s = cond_src[i]
            slab1 = slab1.at[x_off[s]:x_off[s] + x_dims[s],
                             CI + i * I:CI + (i + 1) * I].set(Wc1s[i][B:, :])
        for i in range(3):
            slab1 = slab1.at[Xs + i * B:Xs + (i + 1) * B,
                             CI + i * I:CI + (i + 1) * I].set(Wc1s[i][:B, :])
        slab1 = slab1.at[Xs + 3 * B, :CI].set(jnp.concatenate(b1s))
        slab1 = slab1.at[Xs + 3 * B, CI:].set(jnp.concatenate(bc1s))

        # ---- weight slab 2: (CI + 1, 6B + 6D) ----
        # cols [0,6B): W2 with output order [mu_v,mu_a,mu_t | lv_v,lv_a,lv_t]
        # cols [6B, 6B+6D): Wc2 with order [mu_cv,mu_ca,mu_ct | lv_cv,lv_ca,lv_ct]
        slab2 = jnp.zeros((CI + 1, 6 * B + 6 * D), jnp.float32)
        for i in range(3):
            r0, r1 = i * I, (i + 1) * I
            slab2 = slab2.at[r0:r1, i * B:(i + 1) * B].set(W2s[i][:, :B])
            slab2 = slab2.at[r0:r1, 3 * B + i * B:3 * B + (i + 1) * B].set(W2s[i][:, B:])
            slab2 = slab2.at[r0:r1, 6 * B + i * D:6 * B + (i + 1) * D].set(Wmus[i])
            slab2 = slab2.at[r0:r1,
                             6 * B + 3 * D + i * D:6 * B + 3 * D + (i + 1) * D].set(Wlvs[i])
        slab2 = slab2.at[CI, 0:3 * B].set(
            jnp.concatenate([b2s[i][:B] for i in range(3)]))
        slab2 = slab2.at[CI, 3 * B:6 * B].set(
            jnp.concatenate([b2s[i][B:] for i in range(3)]))
        slab2 = slab2.at[CI, 6 * B:6 * B + 3 * D].set(jnp.concatenate(bmus))
        slab2 = slab2.at[CI, 6 * B + 3 * D:].set(jnp.concatenate(blvs))

        self.slab1, self.slab2 = slab1, slab2
        self._fwd = _make_forward(x_dims, I, B, D, beta, gamma, sigma)

    def forward(self, visual, acoustic, text, labels, rng):
        return self._fwd(self.slab1, self.slab2, visual, acoustic, text,
                         labels, rng)


if __name__ == "__main__":
    key = jax.random.PRNGKey(0)
    k_param, k_data, k_noise = jax.random.split(key, 3)

    # small shapes consistent with the module's MLP forward
    N = 8
    X0_dim, X1_dim, X2_dim = 16, 12, 20
    inter_dim, B_dim, output_dim = 32, 8, 4

    model = CIBModelPallas(X0_dim, X1_dim, X2_dim, inter_dim, B_dim, output_dim,
                           p_lambda=0.1, beta=1.0, gamma=0.5, sigma=0.5,
                           drop_prob=0.1, key=k_param)

    kd = jax.random.split(k_data, 4)
    visual = jax.random.normal(kd[0], (N, X0_dim), jnp.float32)
    acoustic = jax.random.normal(kd[1], (N, X1_dim), jnp.float32)
    text = jax.random.normal(kd[2], (N, X2_dim), jnp.float32)
    labels = jax.random.normal(kd[3], (N, 1), jnp.float32)

    outs = model.forward(visual, acoustic, text, labels, k_noise)
    outs = jax.block_until_ready(outs)

    output, total_loss = outs[0], outs[1]
    assert output.shape == (N, 3 * B_dim)
    assert total_loss.shape == ()
    assert bool(jnp.all(jnp.isfinite(output)))
    assert bool(jnp.isfinite(total_loss))
    for v in outs[2:]:
        assert bool(jnp.isfinite(v))
    print("KERNEL_OK")
</pallas_src>

<mosaic_0001>
module attributes {stable_mosaic.version = 11 : i64} {
  func.func @_cib_fused_kernel(%arg0: memref<8x85xf32, #tpu.memory_space<vmem>>, %arg1: memref<73x192xf32, #tpu.memory_space<vmem>>, %arg2: memref<97x72xf32, #tpu.memory_space<vmem>>, %arg3: memref<8x24xf32, #tpu.memory_space<vmem>>, %arg4: memref<1x8xf32, #tpu.memory_space<vmem>>) attributes {dimension_semantics = [], scalar_prefetch = 0 : i64, scratch_operands = 0 : i64, tpu.core_type = #tpu.core_type<tc>} {
    %c0 = arith.constant 0 : index
    %c0_0 = arith.constant 0 : index
    %0 = vector.load %arg0[%c0, %c0_0] : memref<8x85xf32, #tpu.memory_space<vmem>>, vector<8x85xf32>
    %1 = vector.extract_strided_slice %0 {offsets = [0, 0], sizes = [8, 48], strides = [1, 1]} : vector<8x85xf32> to vector<8x48xf32>
    %2 = vector.extract_strided_slice %0 {offsets = [0, 48], sizes = [8, 1], strides = [1, 1]} : vector<8x85xf32> to vector<8x1xf32>
    %3 = vector.extract_strided_slice %0 {offsets = [0, 49], sizes = [8, 24], strides = [1, 1]} : vector<8x85xf32> to vector<8x24xf32>
    %4 = vector.extract_strided_slice %0 {offsets = [0, 73], sizes = [8, 12], strides = [1, 1]} : vector<8x85xf32> to vector<8x12xf32>
    %c0_1 = arith.constant 0 : index
    %c0_2 = arith.constant 0 : index
    %5 = vector.load %arg1[%c0_1, %c0_2] : memref<73x192xf32, #tpu.memory_space<vmem>>, vector<73x192xf32>
    %6 = vector.extract_strided_slice %5 {offsets = [0, 0], sizes = [48, 192], strides = [1, 1]} : vector<73x192xf32> to vector<48x192xf32>
    %7 = vector.extract_strided_slice %5 {offsets = [48, 96], sizes = [24, 96], strides = [1, 1]} : vector<73x192xf32> to vector<24x96xf32>
    %8 = vector.extract_strided_slice %5 {offsets = [72, 0], sizes = [1, 192], strides = [1, 1]} : vector<73x192xf32> to vector<1x192xf32>
    %9 = vector.extract_strided_slice %8 {offsets = [0, 0], sizes = [1, 96], strides = [1, 1]} : vector<1x192xf32> to vector<1x96xf32>
    %10 = vector.extract_strided_slice %8 {offsets = [0, 96], sizes = [1, 96], strides = [1, 1]} : vector<1x192xf32> to vector<1x96xf32>
    %c0_3 = arith.constant 0 : index
    %c0_4 = arith.constant 0 : index
    %11 = vector.load %arg2[%c0_3, %c0_4] : memref<97x72xf32, #tpu.memory_space<vmem>>, vector<97x72xf32>
    %12 = vector.extract_strided_slice %11 {offsets = [0, 0], sizes = [96, 48], strides = [1, 1]} : vector<97x72xf32> to vector<96x48xf32>
    %13 = vector.extract_strided_slice %11 {offsets = [0, 48], sizes = [96, 24], strides = [1, 1]} : vector<97x72xf32> to vector<96x24xf32>
    %14 = vector.extract_strided_slice %11 {offsets = [96, 0], sizes = [1, 72], strides = [1, 1]} : vector<97x72xf32> to vector<1x72xf32>
    %15 = vector.extract_strided_slice %14 {offsets = [0, 0], sizes = [1, 48], strides = [1, 1]} : vector<1x72xf32> to vector<1x48xf32>
    %16 = vector.extract_strided_slice %14 {offsets = [0, 48], sizes = [1, 24], strides = [1, 1]} : vector<1x72xf32> to vector<1x24xf32>
    %cst = arith.constant dense<0.000000e+00> : vector<8x192xf32>
    %17 = tpu.matmul %1, %6, %cst {dimension_numbers = #tpu.dot_dimension_numbers<[1], [0], [0], [1], [0, 0, 1, 1], [], []>} : vector<8x48xf32>, vector<48x192xf32>, vector<8x192xf32> -> vector<8x192xf32>
    %18 = vector.extract_strided_slice %17 {offsets = [0, 0], sizes = [8, 96], strides = [1, 1]} : vector<8x192xf32> to vector<8x96xf32>
    %19 = vector.broadcast %9 : vector<1x96xf32> to vector<8x96xf32>
    %20 = arith.addf %18, %19 : vector<8x96xf32>
    %cst_5 = arith.constant 0.000000e+00 : f32
    %21 = vector.broadcast %cst_5 : f32 to vector<8x96xf32>
    %22 = arith.maximumf %20, %21 : vector<8x96xf32>
    %cst_6 = arith.constant dense<0.000000e+00> : vector<8x48xf32>
    %23 = tpu.matmul %22, %12, %cst_6 {dimension_numbers = #tpu.dot_dimension_numbers<[1], [0], [0], [1], [0, 0, 1, 1], [], []>} : vector<8x96xf32>, vector<96x48xf32>, vector<8x48xf32> -> vector<8x48xf32>
    %24 = vector.broadcast %15 : vector<1x48xf32> to vector<8x48xf32>
    %25 = arith.addf %23, %24 : vector<8x48xf32>
    %26 = vector.extract_strided_slice %25 {offsets = [0, 0], sizes = [8, 24], strides = [1, 1]} : vector<8x48xf32> to vector<8x24xf32>
    %27 = vector.extract_strided_slice %25 {offsets = [0, 24], sizes = [8, 24], strides = [1, 1]} : vector<8x48xf32> to vector<8x24xf32>
    %cst_7 = arith.constant 5.000000e-01 : f32
    %28 = vector.broadcast %cst_7 : f32 to vector<8x24xf32>
    %29 = arith.mulf %28, %27 : vector<8x24xf32>
    %30 = math.exp %29 : vector<8x24xf32>
    %31 = arith.mulf %3, %30 : vector<8x24xf32>
    %32 = arith.addf %26, %31 : vector<8x24xf32>
    %c0_8 = arith.constant 0 : index
    %c0_9 = arith.constant 0 : index
    %33 = vector.load %arg3[%c0_8, %c0_9] : memref<8x24xf32, #tpu.memory_space<vmem>>, vector<8x24xf32>
    tpu.vector_store %arg3[%c0_8, %c0_9], %32 {strides = array<i32>} : memref<8x24xf32, #tpu.memory_space<vmem>>, vector<8x24xf32>,
    %cst_10 = arith.constant 1.000000e+00 : f32
    %34 = vector.broadcast %cst_10 : f32 to vector<8x24xf32>
    %35 = arith.addf %34, %27 : vector<8x24xf32>
    %36 = arith.mulf %26, %26 : vector<8x24xf32>
    %37 = arith.subf %35, %36 : vector<8x24xf32>
    %38 = arith.mulf %30, %30 : vector<8x24xf32>
    %39 = arith.subf %37, %38 : vector<8x24xf32>
    %cst_11 = arith.constant dense<0.000000e+00> : vector<8x96xf32>
    %40 = tpu.matmul %32, %7, %cst_11 {dimension_numbers = #tpu.dot_dimension_numbers<[1], [0], [0], [1], [0, 0, 1, 1], [], []>} : vector<8x24xf32>, vector<24x96xf32>, vector<8x96xf32> -> vector<8x96xf32>
    %41 = vector.extract_strided_slice %17 {offsets = [0, 96], sizes = [8, 96], strides = [1, 1]} : vector<8x192xf32> to vector<8x96xf32>
    %42 = arith.addf %40, %41 : vector<8x96xf32>
    %43 = vector.broadcast %10 : vector<1x96xf32> to vector<8x96xf32>
    %44 = arith.addf %42, %43 : vector<8x96xf32>
    %cst_12 = arith.constant 0.000000e+00 : f32
    %45 = vector.broadcast %cst_12 : f32 to vector<8x96xf32>
    %46 = arith.maximumf %44, %45 : vector<8x96xf32>
    %cst_13 = arith.constant dense<0.000000e+00> : vector<8x24xf32>
    %47 = tpu.matmul %46, %13, %cst_13 {dimension_numbers = #tpu.dot_dimension_numbers<[1], [0], [0], [1], [0, 0, 1, 1], [], []>} : vector<8x96xf32>, vector<96x24xf32>, vector<8x24xf32> -> vector<8x24xf32>
    %48 = vector.broadcast %16 : vector<1x24xf32> to vector<8x24xf32>
    %49 = arith.addf %47, %48 : vector<8x24xf32>
    %50 = vector.extract_strided_slice %49 {offsets = [0, 0], sizes = [8, 12], strides = [1, 1]} : vector<8x24xf32> to vector<8x12xf32>
    %51 = vector.extract_strided_slice %49 {offsets = [0, 12], sizes = [8, 12], strides = [1, 1]} : vector<8x24xf32> to vector<8x12xf32>
    %cst_14 = arith.constant 5.000000e-01 : f32
    %52 = vector.broadcast %cst_14 : f32 to vector<8x12xf32>
    %53 = arith.mulf %52, %51 : vector<8x12xf32>
    %54 = math.exp %53 : vector<8x12xf32>
    %55 = arith.mulf %4, %54 : vector<8x12xf32>
    %56 = arith.addf %50, %55 : vector<8x12xf32>
    %57 = vector.broadcast %2 : vector<8x1xf32> to vector<8x12xf32>
    %58 = arith.subf %56, %57 : vector<8x12xf32>
    %59 = arith.mulf %58, %58 : vector<8x12xf32>
    %cst_15 = arith.constant 1.000000e+00 : f32
    %60 = vector.broadcast %cst_15 : f32 to vector<8x12xf32>
    %61 = arith.addf %60, %51 : vector<8x12xf32>
    %62 = arith.mulf %50, %50 : vector<8x12xf32>
    %63 = arith.subf %61, %62 : vector<8x12xf32>
    %64 = arith.mulf %54, %54 : vector<8x12xf32>
    %65 = arith.subf %63, %64 : vector<8x12xf32>
    %66 = vector.extract_strided_slice %39 {offsets = [0, 0], sizes = [8, 8], strides = [1, 1]} : vector<8x24xf32> to vector<8x8xf32>
    %67 = vector.shape_cast %66 : vector<8x8xf32> to vector<1x8x8xf32>
    %cst_16 = arith.constant dense<0.000000e+00> : vector<1xf32>
    %68 = vector.multi_reduction <add>, %67, %cst_16 [1, 2] : vector<1x8x8xf32> to vector<1xf32>
    %69 = vector.shape_cast %68 : vector<1xf32> to vector<1x1x1xf32>
    %70 = vector.extract %69[0, 0, 0] : f32 from vector<1x1x1xf32>
    %71 = vector.broadcast %70 : f32 to vector<1x1xf32>
    %cst_17 = arith.constant -7.812500e-03 : f32
    %72 = vector.broadcast %cst_17 : f32 to vector<1x1xf32>
    %73 = arith.mulf %72, %71 : vector<1x1xf32>
    %74 = vector.extract_strided_slice %59 {offsets = [0, 0], sizes = [8, 4], strides = [1, 1]} : vector<8x12xf32> to vector<8x4xf32>
    %75 = vector.shape_cast %74 : vector<8x4xf32> to vector<1x8x4xf32>
    %cst_18 = arith.constant dense<0.000000e+00> : vector<1xf32>
    %76 = vector.multi_reduction <add>, %75, %cst_18 [1, 2] : vector<1x8x4xf32> to vector<1xf32>
    %77 = vector.shape_cast %76 : vector<1xf32> to vector<1x1x1xf32>
    %78 = vector.extract %77[0, 0, 0] : f32 from vector<1x1x1xf32>
    %79 = vector.broadcast %78 : f32 to vector<1x1xf32>
    %cst_19 = arith.constant 3.200000e+01 : f32
    %80 = vector.broadcast %cst_19 : f32 to vector<1x1xf32>
    %81 = arith.divf %79, %80 : vector<1x1xf32>
    %82 = vector.extract_strided_slice %65 {offsets = [0, 0], sizes = [8, 4], strides = [1, 1]} : vector<8x12xf32> to vector<8x4xf32>
    %83 = vector.shape_cast %82 : vector<8x4xf32> to vector<1x8x4xf32>
    %cst_20 = arith.constant dense<0.000000e+00> : vector<1xf32>
    %84 = vector.multi_reduction <add>, %83, %cst_20 [1, 2] : vector<1x8x4xf32> to vector<1xf32>
    %85 = vector.shape_cast %84 : vector<1xf32> to vector<1x1x1xf32>
    %86 = vector.extract %85[0, 0, 0] : f32 from vector<1x1x1xf32>
    %87 = vector.broadcast %86 : f32 to vector<1x1xf32>
    %cst_21 = arith.constant -6.250000e-02 : f32
    %88 = vector.broadcast %cst_21 : f32 to vector<1x1xf32>
    %89 = arith.mulf %88, %87 : vector<1x1xf32>
    %90 = arith.addf %81, %89 : vector<1x1xf32>
    %91 = vector.extract_strided_slice %39 {offsets = [0, 8], sizes = [8, 8], strides = [1, 1]} : vector<8x24xf32> to vector<8x8xf32>
    %92 = vector.shape_cast %91 : vector<8x8xf32> to vector<1x8x8xf32>
    %cst_22 = arith.constant dense<0.000000e+00> : vector<1xf32>
    %93 = vector.multi_reduction <add>, %92, %cst_22 [1, 2] : vector<1x8x8xf32> to vector<1xf32>
    %94 = vector.shape_cast %93 : vector<1xf32> to vector<1x1x1xf32>
    %95 = vector.extract %94[0, 0, 0] : f32 from vector<1x1x1xf32>
    %96 = vector.broadcast %95 : f32 to vector<1x1xf32>
    %cst_23 = arith.constant -7.812500e-03 : f32
    %97 = vector.broadcast %cst_23 : f32 to vector<1x1xf32>
    %98 = arith.mulf %97, %96 : vector<1x1xf32>
    %99 = vector.extract_strided_slice %59 {offsets = [0, 4], sizes = [8, 4], strides = [1, 1]} : vector<8x12xf32> to vector<8x4xf32>
    %100 = vector.shape_cast %99 : vector<8x4xf32> to vector<1x8x4xf32>
    %cst_24 = arith.constant dense<0.000000e+00> : vector<1xf32>
    %101 = vector.multi_reduction <add>, %100, %cst_24 [1, 2] : vector<1x8x4xf32> to vector<1xf32>
    %102 = vector.shape_cast %101 : vector<1xf32> to vector<1x1x1xf32>
    %103 = vector.extract %102[0, 0, 0] : f32 from vector<1x1x1xf32>
    %104 = vector.broadcast %103 : f32 to vector<1x1xf32>
    %cst_25 = arith.constant 3.200000e+01 : f32
    %105 = vector.broadcast %cst_25 : f32 to vector<1x1xf32>
    %106 = arith.divf %104, %105 : vector<1x1xf32>
    %107 = vector.extract_strided_slice %65 {offsets = [0, 4], sizes = [8, 4], strides = [1, 1]} : vector<8x12xf32> to vector<8x4xf32>
    %108 = vector.shape_cast %107 : vector<8x4xf32> to vector<1x8x4xf32>
    %cst_26 = arith.constant dense<0.000000e+00> : vector<1xf32>
    %109 = vector.multi_reduction <add>, %108, %cst_26 [1, 2] : vector<1x8x4xf32> to vector<1xf32>
    %110 = vector.shape_cast %109 : vector<1xf32> to vector<1x1x1xf32>
    %111 = vector.extract %110[0, 0, 0] : f32 from vector<1x1x1xf32>
    %112 = vector.broadcast %111 : f32 to vector<1x1xf32>
    %cst_27 = arith.constant -6.250000e-02 : f32
    %113 = vector.broadcast %cst_27 : f32 to vector<1x1xf32>
    %114 = arith.mulf %113, %112 : vector<1x1xf32>
    %115 = arith.addf %106, %114 : vector<1x1xf32>
    %116 = vector.extract_strided_slice %39 {offsets = [0, 16], sizes = [8, 8], strides = [1, 1]} : vector<8x24xf32> to vector<8x8xf32>
    %117 = vector.shape_cast %116 : vector<8x8xf32> to vector<1x8x8xf32>
    %cst_28 = arith.constant dense<0.000000e+00> : vector<1xf32>
    %118 = vector.multi_reduction <add>, %117, %cst_28 [1, 2] : vector<1x8x8xf32> to vector<1xf32>
    %119 = vector.shape_cast %118 : vector<1xf32> to vector<1x1x1xf32>
    %120 = vector.extract %119[0, 0, 0] : f32 from vector<1x1x1xf32>
    %121 = vector.broadcast %120 : f32 to vector<1x1xf32>
    %cst_29 = arith.constant -7.812500e-03 : f32
    %122 = vector.broadcast %cst_29 : f32 to vector<1x1xf32>
    %123 = arith.mulf %122, %121 : vector<1x1xf32>
    %124 = vector.extract_strided_slice %59 {offsets = [0, 8], sizes = [8, 4], strides = [1, 1]} : vector<8x12xf32> to vector<8x4xf32>
    %125 = vector.shape_cast %124 : vector<8x4xf32> to vector<1x8x4xf32>
    %cst_30 = arith.constant dense<0.000000e+00> : vector<1xf32>
    %126 = vector.multi_reduction <add>, %125, %cst_30 [1, 2] : vector<1x8x4xf32> to vector<1xf32>
    %127 = vector.shape_cast %126 : vector<1xf32> to vector<1x1x1xf32>
    %128 = vector.extract %127[0, 0, 0] : f32 from vector<1x1x1xf32>
    %129 = vector.broadcast %128 : f32 to vector<1x1xf32>
    %cst_31 = arith.constant 3.200000e+01 : f32
    %130 = vector.broadcast %cst_31 : f32 to vector<1x1xf32>
    %131 = arith.divf %129, %130 : vector<1x1xf32>
    %132 = vector.extract_strided_slice %65 {offsets = [0, 8], sizes = [8, 4], strides = [1, 1]} : vector<8x12xf32> to vector<8x4xf32>
    %133 = vector.shape_cast %132 : vector<8x4xf32> to vector<1x8x4xf32>
    %cst_32 = arith.constant dense<0.000000e+00> : vector<1xf32>
    %134 = vector.multi_reduction <add>, %133, %cst_32 [1, 2] : vector<1x8x4xf32> to vector<1xf32>
    %135 = vector.shape_cast %134 : vector<1xf32> to vector<1x1x1xf32>
    %136 = vector.extract %135[0, 0, 0] : f32 from vector<1x1x1xf32>
    %137 = vector.broadcast %136 : f32 to vector<1x1xf32>
    %cst_33 = arith.constant -6.250000e-02 : f32
    %138 = vector.broadcast %cst_33 : f32 to vector<1x1xf32>
    %139 = arith.mulf %138, %137 : vector<1x1xf32>
    %140 = arith.addf %131, %139 : vector<1x1xf32>
    %cst_34 = arith.constant 0.000000e+00 : f32
    %141 = vector.broadcast %cst_34 : f32 to vector<1x1xf32>
    %142 = tpu.concatenate %73, %90, %98, %115, %123, %140, %141, %141 in 1 : vector<1x1xf32>, vector<1x1xf32>, vector<1x1xf32>, vector<1x1xf32>, vector<1x1xf32>, vector<1x1xf32>, vector<1x1xf32>, vector<1x1xf32> -> vector<1x8xf32>
    %c0_35 = arith.constant 0 : index
    %c0_36 = arith.constant 0 : index
    %143 = vector.load %arg4[%c0_35, %c0_36] : memref<1x8xf32, #tpu.memory_space<vmem>>, vector<1x8xf32>
    tpu.vector_store %arg4[%c0_35, %c0_36], %142 {strides = array<i32>} : memref<1x8xf32, #tpu.memory_space<vmem>>, vector<1x8xf32>,
    return
  }
}

</mosaic_0001>

<bundles_post_ra>
// kernel: fwd.1
= control target key start
LH: loop header
LB: loop body
LE: loop exit
PB: predicated region body
PF: predicated region fallthrough
CT: control target
= control target key end

     0   :  { %s849_s0 = inlined_call_operand.vmem [shape: f32[8,85], index: 0, kind: input, shape index: {}]   ;;  %s850_s1 = inlined_call_operand.vmem [shape: f32[73,192], index: 1, kind: input, shape index: {}]   ;;  %s851_s2 = inlined_call_operand.vmem [shape: f32[97,72], index: 2, kind: input, shape index: {}]   ;;  %s852_s3 = inlined_call_operand.hbm [shape: f32[8,24], index: 3, kind: output, shape index: {0}]   ;;  %s853_s4 = inlined_call_operand.vmem [shape: f32[1,8], index: 4, kind: output, shape index: {1}]  }
   0x1   :  { %v28_v0 = vld [vmem:[%s850_s1 + $0x50] sm:$0xff]  ;;  %v26_v1 = vld [vmem:[%s850_s1 + $0x40] sm:$0xff]  ;;  %v49_v4 = vld [vmem:[%s851_s2 + $0x58] sm:$0xff] }
   0x2   :  { %65 = vmatpush.msra.mxu0 %v28_v0  ;;  %v24_v2 = vld [vmem:[%s850_s1 + $0x30] sm:$0xff]  ;;  %v22_v3 = vld [vmem:[%s850_s1 + $0x20] sm:$0xff]  ;;  %107 = vmatpush.msra.mxu2 %v49_v4  ;;  %v688_v7 = vld [vmem:[%s851_s2 + $0x48] sm:$0xff] }
   0x3   :  { %v48_v5 = vld [vmem:[%s851_s2 + $0x50] sm:$0xff]  ;;  %v693_v8 = vld [vmem:[%s851_s2 + $0x40] sm:$0xff]  ;;  %v698_v9 = vld [vmem:[%s851_s2 + $0x38] sm:$0xff] }
   0x4   :  { %66 = vmatpush.msra.mxu0 %v26_v1  ;;  %v556_v6 = vpack.i.bf16 %v48_v5, %v49_v4  ;;  %v561_v10 = vpack.i.bf16 %v693_v8, %v688_v7  ;;  %v705_v11 = vld [vmem:[%s851_s2 + $0x30] sm:$0xff]  ;;  %v43_v12 = vld [vmem:[%s851_s2 + $0x28] sm:$0xff]  ;;  %v42_v13 = vld [vmem:[%s851_s2 + $0x20] sm:$0xff]  ;;  %108 = vmatpush.msra.mxu2 %v48_v5 }
   0x5   :  { %v566_v14 = vpack.i.bf16 %v705_v11, %v698_v9  ;;  %v571_v15 = vpack.i.bf16 %v42_v13, %v43_v12  ;;  %v20_v16 = vld [vmem:[%s850_s1 + $0x10] sm:$0xff] }
   0x6   :  { %67 = vmatpush.msra.mxu0 %v24_v2 }
   0x7   :  { %10 = vsyncpa [#allocation3], 0  ;;  %109 = vmatpush.msra.mxu2 %v688_v7  ;;  %v18_v17 = vld [vmem:[%s850_s1] sm:$0xff]  ;;  %vm51_vm0 = vcmask 392192   ;;  %v41_v19 = vld [vmem:[%s851_s2 + $0x18] sm:$0xff]  ;;  %s623_s30 = smov 32  }
   0x8   :  { %68 = vmatpush.msra.mxu0 %v22_v3  ;;  %v725_v18 = vld [vmem:[%s849_s0] sm:$0xff]  ;;  %v40_v20 = vld [vmem:[%s851_s2 + $0x10] sm:$0xff]  ;;  %v39_v21 = vld [vmem:[%s851_s2 + $0x8] sm:$0xff]  ;;  %s624_s5 = smov 80   ;;  %vm99_vm1 = vcmask 785408   ;;  %s625_s21 = smov 24  }
   0x9   :  { %110 = vmatpush.msra.mxu2 %v693_v8  ;;  %v38_v22 = vld [vmem:[%s851_s2] sm:$0xff]  ;;  %v31_v24 = vld [vmem:[%s850_s1 + $0x68] sm:$0xff]  ;;  %v576_v26 = vpack.i.bf16 %v40_v20, %v41_v19  ;;  %v588_v27 = vld [vmem:[%s850_s1 + $0x90] ss:$0 sm:$0xff]  ;;  %s626_s22 = smov 25   ;;  %s627_s6 = smov 79  }
   0xa   :  { %69 = vmatpush.msra.mxu0 %v20_v16  ;;  %v30_v23 = vld [vmem:[%s850_s1 + $0x60] sm:$0xff]  ;;  %v581_v31 = vpack.i.bf16 %v38_v22, %v39_v21  ;;  %v29_v32 = vld [vmem:[%s850_s1 + $0x58] sm:$0xff]  ;;  %v27_v33 = vld [vmem:[%s850_s1 + $0x48] sm:$0xff]  ;;  %vm165_vm2 = vcmask 261120   ;;  %vm136_vm3 = vcmask 195584   ;;  %s631_s8 = smov 55  }
   0xb   :  { %111 = vmatpush.msra.mxu2 %v698_v9  ;;  %v551_v25 = vpack.i.bf16 %v31_v24, %v30_v23  ;;  %85 = vmatpush.msra.mxu1 %v29_v32  ;;  %v25_v34 = vld [vmem:[%s850_s1 + $0x38] sm:$0xff]  ;;  %v23_v35 = vld [vmem:[%s850_s1 + $0x28] sm:$0xff]  ;;  %v589_v38 = vld [vmem:[%s851_s2 + $0x60] ss:$0 sm:$0xff]  ;;  %s632_s9 = smov 104   ;;  %s633_s10 = smov 116  }
   0xc   :  { %70 = vmatpush.msra.mxu0 %v18_v17  ;;  %v21_v36 = vld [vmem:[%s850_s1 + $0x18] sm:$0xff]  ;;  %v19_v37 = vld [vmem:[%s850_s1 + $0x8] sm:$0xff]  ;;  %v34_v45 = vld [vmem:[%s850_s1 + $0x80] sm:$0xff]  ;;  %s634_s11 = smov 96   ;;  %s635_s12 = smov 88   ;;  %vm321_vm4 = vcmask 64512  }
   0xd   :  { %499 = vmatmul.msk.f32.vlgmr.msra.gmra.mxu0 %vm51_vm0, %v725_v18  ;;  %112 = vmatpush.msra.mxu2 %v705_v11  ;;  %v35_v46 = vld [vmem:[%s850_s1 + $0x88] sm:$0xff]  ;;  %v32_v48 = vld [vmem:[%s850_s1 + $0x70] sm:$0xff]  ;;  %v33_v49 = vld [vmem:[%s850_s1 + $0x78] sm:$0xff]  ;;  %s636_s13 = smov 112   ;;  %s637_s14 = smov 124   ;;  %vm334_vm5 = vcmask 31744  }
   0xe   :  { %552 = vrot.lane.b32.xlu2 %v551_v25, %s623_s30  ;;  %86 = vmatpush.msra.mxu1 %v27_v33  ;;  %v541_v47 = vpack.i.bf16 %v35_v46, %v34_v45  ;;  %v546_v50 = vpack.i.bf16 %v33_v49, %v32_v48  ;;  %v590_v2 = vld [vmem:[%s850_s1 + $0x98] ss:$0 sm:$0xff]  ;;  %s628_s1 = smov 61   ;;  %s638_s15 = smov 120   ;;  %vm464_vm7 = vcmask 7168   ;;  %vm466_vm8 = vcmask 15360  }
   0xf   :  { %113 = vmatpush.msra.mxu2 %v43_v12  ;;  %s639_s16 = smov 108   ;;  %s640_s17 = smov [#allocation2]   ;;  %vm468_vm9 = vcmask 23552   ;;  %vm471_vm10 = vcmask 39936   ;;  %vm473_vm11 = vcmask 48128   ;;  %vm475_vm12 = vcmask 56320  }
  0x10   :  { %87 = vmatpush.msra.mxu1 %v25_v34  ;;  %547 = vrot.lane.b32.xlu1 %v546_v50, %s623_s30  ;;  %s484_s18 = sshll.u32 %s640_s17, 4  ;;  %s486_s0 = sshll.u32 %s852_s3, 4  ;;  %vm477_vm13 = vcmask 57344   ;;  %s485_s18 = int_to_ptr.vmem [resolvable:$true] %s484_s18  ;;  %s487_s0 = int_to_ptr.hbm [resolvable:$true] %s486_s0 }
  0x11   :  { %114 = vmatpush.msra.mxu2 %v42_v13 }
  0x12   :  { %88 = vmatpush.msra.mxu1 %v23_v35 }
  0x13   :  { %115 = vmatpush.msra.mxu2 %v41_v19 }
  0x14   :  { %89 = vmatpush.msra.mxu1 %v21_v36 }
  0x15   :  { %116 = vmatpush.msra.mxu2 %v40_v20 }
  0x16   :  { %557 = vrot.lane.b32.xlu2 %v556_v6, %s624_s5  ;;  %90 = vmatpush.msra.mxu1 %v19_v37 }
  0x17   :  { %117 = vmatpush.msra.mxu2 %v39_v21  ;;  %500 = vmatmul.msk.f32.vlgmr.msra.gmra.mxu1 %vm51_vm0, %v725_v18 }
  0x19   :  { %118 = vmatpush.msra.mxu2 %v38_v22 }
  0x1e   :  { %572 = vrot.lane.b32.xlu2 %v571_v15, %s624_s5 }
  0x26   :  { %577 = vrot.lane.b32.xlu2 %v576_v26, %s624_s5 }
  0x2e   :  { %582 = vrot.lane.b32.xlu2 %v581_v31, %s624_s5 }
  0x68   :  { %v553_v62 = vpop.permute.xlu2 %552 }
  0x69   :  { %v555_v63 = vunpack.i.h.bf16 %v553_v62  ;;  %v554_v0 = vunpack.i.l.bf16 %v553_v62 }
  0x6b   :  { %v166_v1 = vsel %vm165_vm2, %v554_v0, %v555_v63 }
  0x70   :  { %v558_v3 = vpop.permute.xlu2 %557 }
  0x71   :  { %v559_v4 = vunpack.i.l.bf16 %v558_v3  ;;  %v560_v5 = vunpack.i.h.bf16 %v558_v3 }
  0x73   :  { %273 = vmatpush.msra.mxu3 %v559_v4 }
  0x75   :  { %274 = vmatpush.msra.mxu3 %v560_v5 }
  0x78   :  { %v573_v11 = vpop.permute.xlu2 %572 }
  0x79   :  { %v574_v15 = vunpack.i.l.bf16 %v573_v11  ;;  %v575_v16 = vunpack.i.h.bf16 %v573_v11 }
  0x80   :  { %v578_v17 = vpop.permute.xlu2 %577 }
  0x81   :  { %v579_v19 = vunpack.i.l.bf16 %v578_v17  ;;  %v580_v20 = vunpack.i.h.bf16 %v578_v17 }
  0x82   :  { %v548_v58 = vpop.permute.xlu1 %547 }
  0x83   :  { %v550_v59 = vunpack.i.h.bf16 %v548_v58  ;;  %v549_v60 = vunpack.i.l.bf16 %v548_v58 }
  0x85   :  { %v167_v61 = vsel %vm165_vm2, %v549_v60, %v550_v59 }
  0x88   :  { %v583_v21 = vpop.permute.xlu2 %582 }
  0x89   :  { %v584_v22 = vunpack.i.l.bf16 %v583_v21  ;;  %v585_v23 = vunpack.i.h.bf16 %v583_v21 }
  0x8a   :  { %v72_v28 = vpop.f32.mrf.mxu0 }
  0x8b   :  { %v96_v29 = vadd.f32 %v588_v27, %v72_v28 }
  0x8d   :  { %v97_v30 = vmax.f32 %v96_v29, 0.0 }
  0x8f   :  { %501 = vmatmul.msk.f32.vlgmr.msra.gmra.mxu2 %vm99_vm1, %v97_v30 }
  0x94   :  { %v92_v53 = vpop.f32.mrf.mxu1 }
 0x112   :  { %v120_v39 = vpop.f32.mrf.mxu2 }
 0x113   :  { %v782_v40 = vadd.f32 %v589_v38, %v120_v39 }
 0x115   :  { %v139_v41 = vmul.f32 %v782_v40, %v782_v40  ;;  %v123_v42 = vmul.f32 0.5, %v782_v40 }
 0x117   :  { %141 = vrot.lane.b32.xlu2 %v139_v41, %s625_s21  ;;  %v124_v43 = vmul.f32 1.442695, %v123_v42  ;;  %v630_v42 = vmov 48  }
 0x118   :  { %586 = vset.pattern.permute.xlu2 %v630_v42  ;;  %587 = vset.pattern.permute.xlu0 %v630_v42 }
 0x119   :  { %591 = vpow2.f32 %v124_v43 }
 0x11f   :  { %v787_v44 = vpop.eup %591  ;;  %303 = vperm.xlu2 %586, %v725_v18  }
 0x120   :  { %127 = vrot.lane.b32.xlu0 %v787_v44, %s626_s22  ;;  %v145_v49 = vmul.f32 %v787_v44, %v787_v44 }
 0x128   :  { %542 = vrot.lane.b32.xlu0 %v541_v47, %s623_s30  ;;  %v138_v47 = vadd.f32 1.0, %v782_v40 }
 0x130   :  { %562 = vrot.lane.b32.xlu0 %v561_v10, %s624_s5 }
 0x138   :  { %174 = vrot.lane.b32.xlu0 %v72_v28, %s623_s30 }
 0x140   :  { %206 = vrot.lane.b32.xlu0 %v588_v27, %s623_s30 }
 0x148   :  { %263 = vrot.lane.b32.xlu0 %v589_v38, %s624_s5 }
 0x171   :  { %v142_v46 = vpop.permute.xlu2 %141 }
 0x172   :  { %v144_v48 = vsub.f32 %v138_v47, %v142_v46 }
 0x192   :  { %v128_v51 = vpop.permute.xlu0 %127 }
 0x193   :  { %v130_v52 = vmul.f32 %v128_v51, %v725_v18 }
 0x195   :  { %132 = vrot.lane.b32.xlu1 %v130_v52, %s627_s6  ;;  %v146_v52 = vsub.f32 %v144_v48, %v145_v49 }
 0x19a   :  { %v543_v54 = vpop.permute.xlu0 %542 }
 0x19b   :  { %v545_v55 = vunpack.i.h.bf16 %v543_v54  ;;  %v544_v56 = vunpack.i.l.bf16 %v543_v54 }
 0x19d   :  { %567 = vrot.lane.b32.xlu1 %v566_v14, %s624_s5  ;;  %v168_v57 = vsel %vm165_vm2, %v544_v56, %v545_v55  ;;  %v304_v56 = vpop.permute.xlu2 %303 }
 0x19e   :  { %196 = vmatpush.msrb.mxu0 %v168_v57 }
 0x1a0   :  { %197 = vmatpush.msrb.mxu0 %v167_v61 }
 0x1a2   :  { %198 = vmatpush.msrb.mxu0 %v166_v1  ;;  %v563_v6 = vpop.permute.xlu0 %562 }
 0x1a3   :  { %v564_v7 = vunpack.i.l.bf16 %v563_v6  ;;  %v565_v8 = vunpack.i.h.bf16 %v563_v6 }
 0x1a5   :  { %176 = vrot.lane.b32.xlu1 %v92_v53, %s623_s30  ;;  %275 = vmatpush.msra.mxu3 %v564_v7 }
 0x1a7   :  { %276 = vmatpush.msra.mxu3 %v565_v8 }
 0x1aa   :  { %v175_v24 = vpop.permute.xlu0 %174 }
 0x1ad   :  { %208 = vrot.lane.b32.xlu1 %v590_v2, %s623_s30  ;;  %s629_s30 = smov 12  }
 0x1b2   :  { %v207_v27 = vpop.permute.xlu0 %206 }
 0x1ba   :  { %v264_v34 = vpop.permute.xlu0 %263 }
 0x207   :  { %v133_v9 = vpop.permute.xlu1 %132 }
 0x208   :  { %v135_v10 = vadd.f32 %v133_v9, %v782_v40 }
 0x20a   :  { %137 = vst.msk [vmem:[#allocation2] sm:$0xff] %vm136_vm3, %v135_v10  ;;  %502 = vmatmul.msk.f32.vlgmr.msrb.gmra.mxu0 %vm136_vm3, %v135_v10 }
 0x20b   :  { %489 = dma.vmem_to_hbm [thread:$0]  %s485_s18, 128, %s487_s0, [#allocation3]  }
 0x20f   :  { %v568_v12 = vpop.permute.xlu1 %567 }
 0x210   :  { %v569_v13 = vunpack.i.l.bf16 %v568_v12  ;;  %v570_v14 = vunpack.i.h.bf16 %v568_v12 }
 0x212   :  { %277 = vmatpush.msra.mxu3 %v569_v13 }
 0x214   :  { %278 = vmatpush.msra.mxu3 %v570_v14 }
 0x216   :  { %279 = vmatpush.msra.mxu3 %v574_v15 }
 0x217   :  { %v177_v25 = vpop.permute.xlu1 %176 }
 0x218   :  { %280 = vmatpush.msra.mxu3 %v575_v16  ;;  %v178_v28 = vsel %vm165_vm2, %v175_v24, %v177_v25 }
 0x21a   :  { %281 = vmatpush.msra.mxu3 %v579_v19 }
 0x21c   :  { %282 = vmatpush.msra.mxu3 %v580_v20 }
 0x21e   :  { %283 = vmatpush.msra.mxu3 %v584_v22 }
 0x21f   :  { %v209_v26 = vpop.permute.xlu1 %208 }
 0x220   :  { %284 = vmatpush.msra.mxu3 %v585_v23  ;;  %v210_v30 = vsel %vm165_vm2, %v207_v27, %v209_v26 }
 0x287   :  { %v200_v29 = vpop.f32.mrf.mxu0 }
 0x288   :  { %v201_v31 = vadd.f32 %v200_v29, %v178_v28 }
 0x28a   :  { %v212_v32 = vadd.f32 %v210_v30, %v201_v31 }
 0x28c   :  { %v213_v33 = vmax.f32 %v212_v32, 0.0 }
 0x28e   :  { %503 = vmatmul.msk.f32.vlgmr.msra.gmra.mxu3 %vm99_vm1, %v213_v33 }
 0x311   :  { %v286_v35 = vpop.f32.mrf.mxu3 }
 0x312   :  { %v287_v36 = vadd.f32 %v286_v35, %v264_v34 }
 0x314   :  { %v289_v37 = vmul.f32 0.5, %v287_v36  ;;  %v309_v41 = vmul.f32 %v287_v36, %v287_v36  ;;  %v308_v50 = vadd.f32 1.0, %v287_v36 }
 0x316   :  { %v290_v38 = vmul.f32 1.442695, %v289_v37 }
 0x318   :  { %593 = vpow2.f32 %v290_v38 }
 0x31e   :  { %v594_v39 = vpop.eup %593 }
 0x31f   :  { %293 = vrot.lane.b32.xlu1 %v594_v39, %s628_s1  ;;  %v315_v54 = vmul.f32 %v594_v39, %v594_v39 }
 0x327   :  { %311 = vrot.lane.b32.xlu1 %v309_v41, %s629_s30 }
 0x391   :  { %v294_v43 = vpop.permute.xlu1 %293 }
 0x392   :  { %v296_v45 = vmul.f32 %v294_v43, %v725_v18 }
 0x394   :  { %298 = vrot.lane.b32.xlu0 %v296_v45, %s631_s8 }
 0x399   :  { %v312_v51 = vpop.permute.xlu1 %311 }
 0x39a   :  { %v314_v53 = vsub.f32 %v308_v50, %v312_v51 }
 0x39c   :  { %v316_v55 = vsub.f32 %v314_v53, %v315_v54  ;;  %318 = vrot.lane.b32.xlu0 %v146_v52, %s632_s9 }
 0x39e   :  { %355 = vrot.lane.b32.xlu2 %v316_v55, %s633_s10 }
 0x3a4   :  { %371 = vrot.lane.b32.xlu0 %v146_v52, %s634_s11 }
 0x3a6   :  { %418 = vrot.lane.b32.xlu2 %v146_v52, %s635_s12 }
 0x3ac   :  { %402 = vrot.lane.b32.xlu0 %v316_v55, %s636_s13 }
 0x3f8   :  { %v356_v1 = vpop.permute.xlu2 %355 }
 0x3f9   :  { %v358_v2 = vsel %vm334_vm5, %v356_v1, 0.0 }
 0x400   :  { %v419_v3 = vpop.permute.xlu2 %418 }
 0x401   :  { %v421_v8 = vsel %vm321_vm4, %v419_v3, 0.0 }
 0x406   :  { %v299_v18 = vpop.permute.xlu0 %298 }
 0x407   :  { %v301_v40 = vadd.f32 %v299_v18, %v287_v36 }
 0x409   :  { %v306_v44 = vsub.f32 %v301_v40, %v304_v56 }
 0x40b   :  { %v307_v57 = vmul.f32 %v306_v44, %v306_v44 }
 0x40d   :  { %387 = vrot.lane.b32.xlu2 %v307_v57, %s637_s14  ;;  %433 = vrot.lane.b32.xlu0 %v307_v57, %s638_s15  ;;  %v335_v0 = vsel %vm334_vm5, %v307_v57, 0.0 }
 0x40e   :  { %v319_v58 = vpop.permute.xlu0 %318 }
 0x40f   :  { %v322_v59 = vsel %vm321_vm4, %v319_v58, 0.0 }
 0x410   :  { %323 = vadd.xlane.f32.xlu1 %v322_v59 }
 0x415   :  { %448 = vrot.lane.b32.xlu2 %v316_v55, %s639_s16 }
 0x416   :  { %v372_v60 = vpop.permute.xlu0 %371 }
 0x417   :  { %v374_v61 = vsel %vm321_vm4, %v372_v60, 0.0 }
 0x418   :  { %375 = vadd.xlane.f32.xlu1 %v374_v61 }
 0x41e   :  { %v403_v62 = vpop.permute.xlu0 %402 }
 0x41f   :  { %v405_v63 = vsel %vm334_vm5, %v403_v62, 0.0 }
 0x420   :  { %406 = vadd.xlane.f32.xlu1 %v405_v63 }
 0x437   :  { %336 = vadd.xlane.f32.xlu0 %v335_v0 }
 0x43e   :  { %359 = vadd.xlane.f32.xlu2 %v358_v2 }
 0x467   :  { %v388_v4 = vpop.permute.xlu2 %387 }
 0x468   :  { %v390_v5 = vsel %vm334_vm5, %v388_v4, 0.0 }
 0x469   :  { %391 = vadd.xlane.f32.xlu1 %v390_v5 }
 0x46f   :  { %v449_v6 = vpop.permute.xlu2 %448 }
 0x470   :  { %v451_v7 = vsel %vm334_vm5, %v449_v6, 0.0 }
 0x471   :  { %452 = vadd.xlane.f32.xlu0 %v451_v7  ;;  %422 = vadd.xlane.f32.xlu1 %v421_v8 }
 0x47f   :  { %v434_v9 = vpop.permute.xlu0 %433 }
 0x480   :  { %v436_v10 = vsel %vm334_vm5, %v434_v9, 0.0 }
 0x481   :  { %437 = vadd.xlane.f32.xlu2 %v436_v10  ;;  %v641_v10 = vmov 32.0  }
 0x482   :  { %595 = vrcp.f32 %v641_v10 }
 0x483   :  { %v324_v11 = vpop.xlane.xlu1 %323 }
 0x484   :  { %v325_v12 = vrot.slane %v324_v11, 4 }
 0x486   :  { %v326_v13 = vadd.f32 %v325_v12, %v324_v11 }
 0x488   :  { %v327_v14 = vrot.slane %v326_v13, 2  ;;  %v596_v11 = vpop.eup %595 }
 0x489   :  { %v347_v12 = vmul.f32 32.0, %v596_v11  ;;  %vm351_vm6 = vweird.f32 %v596_v11 }
 0x48a   :  { %v328_v15 = vadd.f32 %v327_v14, %v326_v13 }
 0x48b   :  { %v376_v19 = vpop.xlane.xlu1 %375  ;;  %v348_v13 = vsub.f32 1.0, %v347_v12 }
 0x48c   :  { %v329_v16 = vrot.slane %v328_v15, 1  ;;  %v377_v20 = vrot.slane %v376_v19, 4 }
 0x48d   :  { %v349_v14 = vmul.f32 %v596_v11, %v348_v13 }
 0x48e   :  { %v330_v17 = vadd.f32 %v329_v16, %v328_v15  ;;  %v378_v23 = vadd.f32 %v377_v20, %v376_v19 }
 0x48f   :  { %v350_v15 = vadd.f32 %v596_v11, %v349_v14 }
 0x490   :  { %504 = vpush %v330_v17  ;;  %v379_v26 = vrot.slane %v378_v23, 2 }
 0x491   :  { %v352_v19 = vsel %vm351_vm6, %v596_v11, %v350_v15 }
 0x492   :  { %v380_v33 = vadd.f32 %v379_v26, %v378_v23 }
 0x493   :  { %v407_v41 = vpop.xlane.xlu1 %406 }
 0x494   :  { %v381_v36 = vrot.slane %v380_v33, 1  ;;  %v408_v42 = vrot.slane %v407_v41, 4 }
 0x496   :  { %v382_v39 = vadd.f32 %v381_v36, %v380_v33  ;;  %v409_v43 = vadd.f32 %v408_v42, %v407_v41 }
 0x498   :  { %v410_v45 = vrot.slane %v409_v43, 2 }
 0x49a   :  { %v411_v49 = vadd.f32 %v410_v45, %v409_v43 }
 0x49c   :  { %v412_v53 = vrot.slane %v411_v49, 1 }
 0x49e   :  { %v413_v56 = vadd.f32 %v412_v53, %v411_v49 }
 0x4aa   :  { %v337_v21 = vpop.xlane.xlu0 %336 }
 0x4ab   :  { %v338_v22 = vrot.slane %v337_v21, 4 }
 0x4ad   :  { %v339_v24 = vadd.f32 %v338_v22, %v337_v21 }
 0x4af   :  { %v340_v25 = vrot.slane %v339_v24, 2 }
 0x4b1   :  { %v360_v27 = vpop.xlane.xlu2 %359  ;;  %v341_v28 = vadd.f32 %v340_v25, %v339_v24 }
 0x4b2   :  { %v361_v29 = vrot.slane %v360_v27, 4 }
 0x4b3   :  { %v342_v30 = vrot.slane %v341_v28, 1 }
 0x4b4   :  { %v362_v31 = vadd.f32 %v361_v29, %v360_v27 }
 0x4b5   :  { %v343_v32 = vadd.f32 %v342_v30, %v341_v28 }
 0x4b6   :  { %v363_v34 = vrot.slane %v362_v31, 2 }
 0x4b7   :  { %506 = vpush %v343_v32 }
 0x4b8   :  { %v364_v35 = vadd.f32 %v363_v34, %v362_v31 }
 0x4ba   :  { %v365_v37 = vrot.slane %v364_v35, 1 }
 0x4bc   :  { %v366_v38 = vadd.f32 %v365_v37, %v364_v35 }
 0x4be   :  { %508 = vpush %v366_v38 }
 0x4bf   :  { %510 = vpush %v382_v39 }
 0x4c1   :  { %s505_s3 = spop %504 }
 0x4c2   :  { %v332_v24 = vstv %s505_s3 }
 0x4c3   :  { %v333_v29 = vmul.f32 -0.0078125, %v332_v24 }
 0x4dc   :  { %v392_v46 = vpop.xlane.xlu1 %391 }
 0x4dd   :  { %v393_v47 = vrot.slane %v392_v46, 4 }
 0x4df   :  { %v394_v48 = vadd.f32 %v393_v47, %v392_v46 }
 0x4e1   :  { %v395_v50 = vrot.slane %v394_v48, 2 }
 0x4e3   :  { %v396_v51 = vadd.f32 %v395_v50, %v394_v48 }
 0x4e4   :  { %v423_v52 = vpop.xlane.xlu1 %422  ;;  %v453_v57 = vpop.xlane.xlu0 %452 }
 0x4e5   :  { %v424_v54 = vrot.slane %v423_v52, 4  ;;  %v397_v55 = vrot.slane %v396_v51, 1  ;;  %v454_v59 = vrot.slane %v453_v57, 4 }
 0x4e7   :  { %v425_v18 = vadd.f32 %v424_v54, %v423_v52  ;;  %v398_v40 = vadd.f32 %v397_v55, %v396_v51  ;;  %v455_v62 = vadd.f32 %v454_v59, %v453_v57 }
 0x4e8   :  { %s507_s21 = spop %506 }
 0x4e9   :  { %v426_v44 = vrot.slane %v425_v18, 2  ;;  %512 = vpush %v398_v40  ;;  %v456_v63 = vrot.slane %v455_v62, 2  ;;  %v345_v17 = vstv %s507_s21 }
 0x4ea   :  { %514 = vpush %v413_v56  ;;  %v353_v23 = vmul.f32 %v352_v19, %v345_v17 }
 0x4eb   :  { %v427_v58 = vadd.f32 %v426_v44, %v425_v18  ;;  %v457_v3 = vadd.f32 %v456_v63, %v455_v62 }
 0x4ed   :  { %v428_v60 = vrot.slane %v427_v58, 1  ;;  %v458_v6 = vrot.slane %v457_v3, 1 }
 0x4ef   :  { %v429_v61 = vadd.f32 %v428_v60, %v427_v58  ;;  %v459_v9 = vadd.f32 %v458_v6, %v457_v3  ;;  %s509_s22 = spop %508 }
 0x4f0   :  { %s511_s23 = spop %510  ;;  %v368_v16 = vstv %s509_s22 }
 0x4f1   :  { %516 = vpush %v429_v61  ;;  %v369_v20 = vmul.f32 -0.0625, %v368_v16  ;;  %v384_v28 = vstv %s511_s23 }
 0x4f2   :  { %v385_v32 = vmul.f32 -0.0078125, %v384_v28 }
 0x4f3   :  { %v370_v25 = vadd.f32 %v369_v20, %v353_v23 }
 0x4f4   :  { %v438_v0 = vpop.xlane.xlu2 %437 }
 0x4f5   :  { %v439_v1 = vrot.slane %v438_v0, 4  ;;  %v465_v31 = vsel %vm464_vm7, %v333_v29, %v370_v25 }
 0x4f6   :  { %v467_v39 = vsel %vm466_vm8, %v465_v31, %v385_v32 }
 0x4f7   :  { %v440_v2 = vadd.f32 %v439_v1, %v438_v0 }
 0x4f9   :  { %v441_v4 = vrot.slane %v440_v2, 2 }
 0x4fb   :  { %v442_v5 = vadd.f32 %v441_v4, %v440_v2 }
 0x4fd   :  { %v443_v7 = vrot.slane %v442_v5, 1 }
 0x4ff   :  { %v444_v8 = vadd.f32 %v443_v7, %v442_v5 }
 0x501   :  { %518 = vpush %v444_v8 }
 0x502   :  { %520 = vpush %v459_v9 }
 0x51a   :  { %s513_s24 = spop %512 }
 0x51b   :  { %s515_s2 = spop %514  ;;  %v400_v21 = vstv %s513_s24 }
 0x51c   :  { %v415_v22 = vstv %s515_s2  ;;  %v401_v26 = vmul.f32 %v400_v21, %v352_v19 }
 0x51d   :  { %v416_v27 = vmul.f32 -0.0625, %v415_v22 }
 0x51f   :  { %v417_v33 = vadd.f32 %v416_v27, %v401_v26 }
 0x521   :  { %v469_v41 = vsel %vm468_vm9, %v467_v39, %v417_v33 }
 0x522   :  { %s517_s25 = spop %516 }
 0x523   :  { %v431_v30 = vstv %s517_s25 }
 0x524   :  { %v432_v35 = vmul.f32 -0.0078125, %v431_v30 }
 0x526   :  { %v470_v43 = vsel %vm334_vm5, %v469_v41, %v432_v35 }
 0x532   :  { %s519_s26 = spop %518 }
 0x533   :  { %v446_v34 = vstv %s519_s26  ;;  %s521_s27 = spop %520 }
 0x534   :  { %v447_v36 = vmul.f32 %v446_v34, %v352_v19  ;;  %v461_v37 = vstv %s521_s27 }
 0x535   :  { %v462_v38 = vmul.f32 -0.0625, %v461_v37 }
 0x537   :  { %v463_v42 = vadd.f32 %v462_v38, %v447_v36 }
 0x539   :  { %v472_v45 = vsel %vm471_vm10, %v470_v43, %v463_v42 }
 0x53a   :  { %v474_v46 = vsel %vm473_vm11, %v472_v45, 0.0 }
 0x53b   :  { %v476_v47 = vsel %vm475_vm12, %v474_v46, 0.0 }
 0x53c   :  { %478 = vst.msk [vmem:[%s853_s4] sm:$0x1] %vm477_vm13, %v476_v47 }
 0x53d   :  { %621 = dma.done.wait [#allocation3], 128  }
 0x53e   :  { %622 = vsyncadd [#allocation3], 4294967168 }
 0x53f   :  { %498 = vsyncpa [#allocation3], 1 }

</bundles_post_ra>
